<compile_context>
chip_gen: v5e
topology: v5e:2x2
jax: 0.10.0
libtpu: 0.0.40
codegen_flags: <defaults>
</compile_context>

<pallas_src>
import functools

import jax
import jax.numpy as jnp
import numpy as np
from jax.experimental import pallas as pl
from jax.experimental.pallas import tpu as pltpu


# ----------------------------------------------------------------------------
# Pallas kernel: full loss head (per-scale epe means + weighted total_loss)
# ----------------------------------------------------------------------------
def _fused_laplacian_loss_kernel(*refs, num_scales, min_variance, weights,
                                 inv_numels):
    """refs = [mean_0, logvar_0, target_0, ..., mean_{S-1}, ..., out].

    Each input ref has shape (B, 2, R, L) with R*L = H*W (free reshape of the
    NCHW tensor).  out is a (num_scales + 1,) float32 SMEM ref holding
    [epe_mean_0 .. epe_mean_{S-1}, total_loss].
    `weights` and `inv_numels` are static Python tuples of floats.
    """
    out_ref = refs[3 * num_scales]
    total = jnp.float32(0.0)
    for i in range(num_scales):
        m = refs[3 * i][...].astype(jnp.float32)        # (B, 2, R, L)
        lv = refs[3 * i + 1][...].astype(jnp.float32)   # (B, 2, R, L)
        t = refs[3 * i + 2][...].astype(jnp.float32)    # (B, 2, R, L)

        var = jnp.exp(lv) + min_variance                # 2 exp per pixel pair
        v0 = var[:, 0]                                  # (B, R, L) full tiles
        v1 = var[:, 1]
        p = v0 * v1
        const = jnp.log(p)                              # == log(v0) + log(v1)

        d0 = t[:, 0] - m[:, 0]
        d1 = t[:, 1] - m[:, 1]
        # == sqrt(d0^2/v0 + d1^2/v1), but with a single divide.
        wepe = jnp.sqrt((d0 * d0 * v1 + d1 * d1 * v0) / p)

        epe = const + wepe                              # (B, R, L)
        # Reduce leading (batch) dim first (pure VPU tile adds), then one
        # cross-lane/sublane reduce per scale.
        s = jnp.sum(jnp.sum(epe, axis=0))               # scalar per-scale sum

        out_ref[i] = s * jnp.float32(inv_numels[i])     # epe_i.mean()
        total = total + jnp.float32(weights[i]) * s     # weighted running sum
    out_ref[num_scales] = total


def _pixels_to_tiles(x):
    """(B, C, H, W) -> (B, C, HW//L, L).  Free reshape: no transpose, no copy."""
    B, C, H, W = x.shape
    n = H * W
    lanes = 128 if n % 128 == 0 else n
    return x.reshape(B, C, n // lanes, lanes)


def multiscale_laplacian_loss(means, logvars, targets, *, min_variance,
                              weights):
    """Returns a (num_scales+1,) vector: per-scale epe means then total_loss."""
    num_scales = len(means)
    flat_inputs = []
    inv_numels = []
    for m, lv, t in zip(means, logvars, targets):
        B, _, H, W = m.shape
        inv_numels.append(1.0 / float(B * H * W))       # numel of (B,1,H,W) epe
        flat_inputs.append(_pixels_to_tiles(m))
        flat_inputs.append(_pixels_to_tiles(lv))
        flat_inputs.append(_pixels_to_tiles(t[:, :2]))

    kernel = functools.partial(_fused_laplacian_loss_kernel,
                               num_scales=num_scales,
                               min_variance=float(min_variance),
                               weights=tuple(float(w) for w in weights),
                               inv_numels=tuple(inv_numels))
    out = pl.pallas_call(
        kernel,
        out_shape=jax.ShapeDtypeStruct((num_scales + 1,), jnp.float32),
        out_specs=pl.BlockSpec(memory_space=pltpu.MemorySpace.SMEM),
        compiler_params=pltpu.CompilerParams(
            # Explicit scoped-VMEM cap: safe on v5e/v6e and on v7x's 64 MiB
            # physical VMEM; the loss-pyramid blocks are far below this.
            vmem_limit_bytes=32 * 1024 * 1024),
    )(*flat_inputs)
    return out


# ----------------------------------------------------------------------------
# Plain-JAX glue (IRR-style downsample2d_as: avg-pool + flow rescale)
# ----------------------------------------------------------------------------
def downsample2d_as(x, target_as):
    h1 = target_as.shape[2]
    h2 = x.shape[2]
    scale = h2 // h1
    assert scale * h1 == h2
    B, C, H, W = x.shape
    x = x.reshape(B, C, H // scale, scale, W // scale, scale).mean(axis=(3, 5))
    return x * (1.0 / scale)


class Args:
    model_div_flow = 0.05
    model_min_variance = 1e-3
    model_log_variance = True


class MultiScaleLaplacianPallas:
    """Training-mode forward of MultiScaleLaplacian; hot path in one Pallas call."""

    def __init__(self, args, num_scales=5, num_highres_scales=2,
                 coarsest_resolution_loss_weight=0.32):
        self._args = args
        self._num_scales = num_scales
        self._min_variance = args.model_min_variance
        self._log_variance = args.model_log_variance
        self._weights = [coarsest_resolution_loss_weight]
        num_lowres_scales = num_scales - num_highres_scales
        for _ in range(num_lowres_scales - 1):
            self._weights += [self._weights[-1] / 4]
        for _ in range(num_highres_scales):
            self._weights += [self._weights[-1] / 2]
        self._weights.reverse()
        assert len(self._weights) == num_scales
        assert self._log_variance  # kernel implements the log-variance branch
        # TODO(synk): eval branch (elementwise_epe / llh / evaluate_auc,
        # sp_plot) is host-side iterative numpy with data-dependent while
        # loops; not ported to Pallas.

    def __call__(self, output_dict, target_dict):
        loss_dict = {}
        outputs = [output_dict[k] for k in ['flow2', 'flow3', 'flow4',
                                            'flow5', 'flow6']]
        target = self._args.model_div_flow * target_dict['target1']
        means = [o[0] for o in outputs]
        logvars = [o[1] for o in outputs]
        targets = [downsample2d_as(target, m) for m in means]

        out = multiscale_laplacian_loss(means, logvars, targets,
                                        min_variance=self._min_variance,
                                        weights=self._weights)

        for i in range(self._num_scales):
            loss_dict['epe%i' % (i + 2)] = out[i]
        loss_dict['total_loss'] = out[self._num_scales]
        return loss_dict


# ----------------------------------------------------------------------------
# Pure-JAX reference (mirrors the PyTorch elementwise_laplacian)
# ----------------------------------------------------------------------------
def elementwise_laplacian_ref(mean, logvar, target, min_variance):
    var = jnp.exp(logvar) + min_variance
    const = jnp.sum(jnp.log(var), axis=1, keepdims=True)
    sq = (target[:, :2] - mean) ** 2
    wepe = jnp.sqrt(jnp.sum(sq / var, axis=1, keepdims=True))
    return const + wepe


def forward_ref(args, weights, output_dict, target_dict):
    outputs = [output_dict[k] for k in ['flow2', 'flow3', 'flow4', 'flow5',
                                        'flow6']]
    target = args.model_div_flow * target_dict['target1']
    total_loss = jnp.float32(0.0)
    loss_dict = {}
    for i, (mean_i, logvar_i) in enumerate(outputs):
        target_i = downsample2d_as(target, mean_i)
        epe_i = elementwise_laplacian_ref(mean_i, logvar_i, target_i,
                                          args.model_min_variance)
        total_loss = total_loss + weights[i] * jnp.sum(epe_i)
        loss_dict['epe%i' % (i + 2)] = jnp.mean(epe_i)
    loss_dict['total_loss'] = total_loss
    return loss_dict


# ----------------------------------------------------------------------------
if __name__ == "__main__":
    key = jax.random.PRNGKey(0)
    B = 2
    H_full = 64  # target1 at full res; flow2..flow6 at 1/4 .. 1/64

    key, kt = jax.random.split(key)
    target_dict = {
        'target1': jax.random.normal(kt, (B, 2, H_full, H_full), jnp.float32) * 4.0
    }

    output_dict = {}
    scales = {'flow2': 16, 'flow3': 8, 'flow4': 4, 'flow5': 2, 'flow6': 1}
    for name, h in scales.items():
        key, km, kv = jax.random.split(key, 3)
        mean = jax.random.normal(km, (B, 2, h, h), jnp.float32)
        logvar = 0.5 * jax.random.normal(kv, (B, 2, h, h), jnp.float32)
        output_dict[name] = (mean, logvar)

    args = Args()
    loss_mod = MultiScaleLaplacianPallas(args)

    out = loss_mod(output_dict, target_dict)
    out = jax.tree_util.tree_map(jax.block_until_ready, out)

    ref = forward_ref(args, loss_mod._weights, output_dict, target_dict)

    for k in ref:
        np.testing.assert_allclose(np.asarray(out[k]), np.asarray(ref[k]),
                                   rtol=2e-4, atol=2e-4)

    print("KERNEL_OK")
</pallas_src>

<mosaic_0001>
module attributes {stable_mosaic.version = 11 : i64} {
  func.func @_fused_laplacian_loss_kernel(%arg0: memref<2x2x2x128xf32, #tpu.memory_space<vmem>>, %arg1: memref<2x2x2x128xf32, #tpu.memory_space<vmem>>, %arg2: memref<2x2x2x128xf32, #tpu.memory_space<vmem>>, %arg3: memref<2x2x1x64xf32, #tpu.memory_space<vmem>>, %arg4: memref<2x2x1x64xf32, #tpu.memory_space<vmem>>, %arg5: memref<2x2x1x64xf32, #tpu.memory_space<vmem>>, %arg6: memref<2x2x1x16xf32, #tpu.memory_space<vmem>>, %arg7: memref<2x2x1x16xf32, #tpu.memory_space<vmem>>, %arg8: memref<2x2x1x16xf32, #tpu.memory_space<vmem>>, %arg9: memref<2x2x1x4xf32, #tpu.memory_space<vmem>>, %arg10: memref<2x2x1x4xf32, #tpu.memory_space<vmem>>, %arg11: memref<2x2x1x4xf32, #tpu.memory_space<vmem>>, %arg12: memref<2x2x1x1xf32, #tpu.memory_space<vmem>>, %arg13: memref<2x2x1x1xf32, #tpu.memory_space<vmem>>, %arg14: memref<2x2x1x1xf32, #tpu.memory_space<vmem>>, %arg15: memref<6xf32, #tpu.memory_space<smem>>) attributes {dimension_semantics = [], scalar_prefetch = 0 : i64, scratch_operands = 0 : i64, tpu.core_type = #tpu.core_type<tc>} {
    %c0 = arith.constant 0 : index
    %c0_0 = arith.constant 0 : index
    %c0_1 = arith.constant 0 : index
    %c0_2 = arith.constant 0 : index
    %0 = vector.load %arg0[%c0, %c0_0, %c0_1, %c0_2] : memref<2x2x2x128xf32, #tpu.memory_space<vmem>>, vector<2x2x2x128xf32>
    %c0_3 = arith.constant 0 : index
    %c0_4 = arith.constant 0 : index
    %c0_5 = arith.constant 0 : index
    %c0_6 = arith.constant 0 : index
    %1 = vector.load %arg1[%c0_3, %c0_4, %c0_5, %c0_6] : memref<2x2x2x128xf32, #tpu.memory_space<vmem>>, vector<2x2x2x128xf32>
    %c0_7 = arith.constant 0 : index
    %c0_8 = arith.constant 0 : index
    %c0_9 = arith.constant 0 : index
    %c0_10 = arith.constant 0 : index
    %2 = vector.load %arg2[%c0_7, %c0_8, %c0_9, %c0_10] : memref<2x2x2x128xf32, #tpu.memory_space<vmem>>, vector<2x2x2x128xf32>
    %3 = math.exp %1 : vector<2x2x2x128xf32>
    %cst = arith.constant 1.000000e-03 : f32
    %4 = vector.broadcast %cst : f32 to vector<2x2x2x128xf32>
    %5 = arith.addf %3, %4 : vector<2x2x2x128xf32>
    %6 = vector.extract_strided_slice %5 {offsets = [0, 0, 0, 0], sizes = [2, 1, 2, 128], strides = [1, 1, 1, 1]} : vector<2x2x2x128xf32> to vector<2x1x2x128xf32>
    %7 = vector.shape_cast %6 : vector<2x1x2x128xf32> to vector<2x2x128xf32>
    %8 = vector.extract_strided_slice %5 {offsets = [0, 1, 0, 0], sizes = [2, 1, 2, 128], strides = [1, 1, 1, 1]} : vector<2x2x2x128xf32> to vector<2x1x2x128xf32>
    %9 = vector.shape_cast %8 : vector<2x1x2x128xf32> to vector<2x2x128xf32>
    %10 = arith.mulf %7, %9 : vector<2x2x128xf32>
    %11 = math.log %10 : vector<2x2x128xf32>
    %12 = vector.extract_strided_slice %2 {offsets = [0, 0, 0, 0], sizes = [2, 1, 2, 128], strides = [1, 1, 1, 1]} : vector<2x2x2x128xf32> to vector<2x1x2x128xf32>
    %13 = vector.shape_cast %12 : vector<2x1x2x128xf32> to vector<2x2x128xf32>
    %14 = vector.extract_strided_slice %0 {offsets = [0, 0, 0, 0], sizes = [2, 1, 2, 128], strides = [1, 1, 1, 1]} : vector<2x2x2x128xf32> to vector<2x1x2x128xf32>
    %15 = vector.shape_cast %14 : vector<2x1x2x128xf32> to vector<2x2x128xf32>
    %16 = arith.subf %13, %15 : vector<2x2x128xf32>
    %17 = vector.extract_strided_slice %2 {offsets = [0, 1, 0, 0], sizes = [2, 1, 2, 128], strides = [1, 1, 1, 1]} : vector<2x2x2x128xf32> to vector<2x1x2x128xf32>
    %18 = vector.shape_cast %17 : vector<2x1x2x128xf32> to vector<2x2x128xf32>
    %19 = vector.extract_strided_slice %0 {offsets = [0, 1, 0, 0], sizes = [2, 1, 2, 128], strides = [1, 1, 1, 1]} : vector<2x2x2x128xf32> to vector<2x1x2x128xf32>
    %20 = vector.shape_cast %19 : vector<2x1x2x128xf32> to vector<2x2x128xf32>
    %21 = arith.subf %18, %20 : vector<2x2x128xf32>
    %22 = arith.mulf %16, %16 : vector<2x2x128xf32>
    %23 = arith.mulf %22, %9 : vector<2x2x128xf32>
    %24 = arith.mulf %21, %21 : vector<2x2x128xf32>
    %25 = arith.mulf %24, %7 : vector<2x2x128xf32>
    %26 = arith.addf %23, %25 : vector<2x2x128xf32>
    %27 = arith.divf %26, %10 : vector<2x2x128xf32>
    %28 = math.sqrt %27 : vector<2x2x128xf32>
    %29 = arith.addf %11, %28 : vector<2x2x128xf32>
    %cst_11 = arith.constant dense<0.000000e+00> : vector<2x128xf32>
    %30 = vector.multi_reduction <add>, %29, %cst_11 [0] : vector<2x2x128xf32> to vector<2x128xf32>
    %31 = vector.shape_cast %30 : vector<2x128xf32> to vector<1x2x128xf32>
    %cst_12 = arith.constant dense<0.000000e+00> : vector<1xf32>
    %32 = vector.multi_reduction <add>, %31, %cst_12 [1, 2] : vector<1x2x128xf32> to vector<1xf32>
    %33 = vector.shape_cast %32 : vector<1xf32> to vector<1x1x1xf32>
    %34 = vector.extract %33[0, 0, 0] : f32 from vector<1x1x1xf32>
    %cst_13 = arith.constant 0.001953125 : f32
    %35 = arith.mulf %34, %cst_13 : f32
    %c0_14 = arith.constant 0 : index
    %36 = memref.load %arg15[%c0_14] : memref<6xf32, #tpu.memory_space<smem>>
    memref.store %35, %arg15[%c0_14] : memref<6xf32, #tpu.memory_space<smem>>
    %cst_15 = arith.constant 5.000000e-03 : f32
    %37 = arith.mulf %cst_15, %34 : f32
    %cst_16 = arith.constant 0.000000e+00 : f32
    %38 = arith.addf %cst_16, %37 : f32
    %c0_17 = arith.constant 0 : index
    %c0_18 = arith.constant 0 : index
    %c0_19 = arith.constant 0 : index
    %c0_20 = arith.constant 0 : index
    %39 = vector.load %arg3[%c0_17, %c0_18, %c0_19, %c0_20] : memref<2x2x1x64xf32, #tpu.memory_space<vmem>>, vector<2x2x1x64xf32>
    %c0_21 = arith.constant 0 : index
    %c0_22 = arith.constant 0 : index
    %c0_23 = arith.constant 0 : index
    %c0_24 = arith.constant 0 : index
    %40 = vector.load %arg4[%c0_21, %c0_22, %c0_23, %c0_24] : memref<2x2x1x64xf32, #tpu.memory_space<vmem>>, vector<2x2x1x64xf32>
    %c0_25 = arith.constant 0 : index
    %c0_26 = arith.constant 0 : index
    %c0_27 = arith.constant 0 : index
    %c0_28 = arith.constant 0 : index
    %41 = vector.load %arg5[%c0_25, %c0_26, %c0_27, %c0_28] : memref<2x2x1x64xf32, #tpu.memory_space<vmem>>, vector<2x2x1x64xf32>
    %42 = math.exp %40 : vector<2x2x1x64xf32>
    %cst_29 = arith.constant 1.000000e-03 : f32
    %43 = vector.broadcast %cst_29 : f32 to vector<2x2x1x64xf32>
    %44 = arith.addf %42, %43 : vector<2x2x1x64xf32>
    %45 = vector.extract_strided_slice %44 {offsets = [0, 0, 0, 0], sizes = [2, 1, 1, 64], strides = [1, 1, 1, 1]} : vector<2x2x1x64xf32> to vector<2x1x1x64xf32>
    %46 = vector.shape_cast %45 : vector<2x1x1x64xf32> to vector<2x1x64xf32>
    %47 = vector.extract_strided_slice %44 {offsets = [0, 1, 0, 0], sizes = [2, 1, 1, 64], strides = [1, 1, 1, 1]} : vector<2x2x1x64xf32> to vector<2x1x1x64xf32>
    %48 = vector.shape_cast %47 : vector<2x1x1x64xf32> to vector<2x1x64xf32>
    %49 = arith.mulf %46, %48 : vector<2x1x64xf32>
    %50 = math.log %49 : vector<2x1x64xf32>
    %51 = vector.extract_strided_slice %41 {offsets = [0, 0, 0, 0], sizes = [2, 1, 1, 64], strides = [1, 1, 1, 1]} : vector<2x2x1x64xf32> to vector<2x1x1x64xf32>
    %52 = vector.shape_cast %51 : vector<2x1x1x64xf32> to vector<2x1x64xf32>
    %53 = vector.extract_strided_slice %39 {offsets = [0, 0, 0, 0], sizes = [2, 1, 1, 64], strides = [1, 1, 1, 1]} : vector<2x2x1x64xf32> to vector<2x1x1x64xf32>
    %54 = vector.shape_cast %53 : vector<2x1x1x64xf32> to vector<2x1x64xf32>
    %55 = arith.subf %52, %54 : vector<2x1x64xf32>
    %56 = vector.extract_strided_slice %41 {offsets = [0, 1, 0, 0], sizes = [2, 1, 1, 64], strides = [1, 1, 1, 1]} : vector<2x2x1x64xf32> to vector<2x1x1x64xf32>
    %57 = vector.shape_cast %56 : vector<2x1x1x64xf32> to vector<2x1x64xf32>
    %58 = vector.extract_strided_slice %39 {offsets = [0, 1, 0, 0], sizes = [2, 1, 1, 64], strides = [1, 1, 1, 1]} : vector<2x2x1x64xf32> to vector<2x1x1x64xf32>
    %59 = vector.shape_cast %58 : vector<2x1x1x64xf32> to vector<2x1x64xf32>
    %60 = arith.subf %57, %59 : vector<2x1x64xf32>
    %61 = arith.mulf %55, %55 : vector<2x1x64xf32>
    %62 = arith.mulf %61, %48 : vector<2x1x64xf32>
    %63 = arith.mulf %60, %60 : vector<2x1x64xf32>
    %64 = arith.mulf %63, %46 : vector<2x1x64xf32>
    %65 = arith.addf %62, %64 : vector<2x1x64xf32>
    %66 = arith.divf %65, %49 : vector<2x1x64xf32>
    %67 = math.sqrt %66 : vector<2x1x64xf32>
    %68 = arith.addf %50, %67 : vector<2x1x64xf32>
    %cst_30 = arith.constant dense<0.000000e+00> : vector<1x64xf32>
    %69 = vector.multi_reduction <add>, %68, %cst_30 [0] : vector<2x1x64xf32> to vector<1x64xf32>
    %70 = vector.shape_cast %69 : vector<1x64xf32> to vector<1x1x64xf32>
    %cst_31 = arith.constant dense<0.000000e+00> : vector<1xf32>
    %71 = vector.multi_reduction <add>, %70, %cst_31 [1, 2] : vector<1x1x64xf32> to vector<1xf32>
    %72 = vector.shape_cast %71 : vector<1xf32> to vector<1x1x1xf32>
    %73 = vector.extract %72[0, 0, 0] : f32 from vector<1x1x1xf32>
    %cst_32 = arith.constant 7.812500e-03 : f32
    %74 = arith.mulf %73, %cst_32 : f32
    %c1 = arith.constant 1 : index
    %75 = memref.load %arg15[%c1] : memref<6xf32, #tpu.memory_space<smem>>
    memref.store %74, %arg15[%c1] : memref<6xf32, #tpu.memory_space<smem>>
    %cst_33 = arith.constant 0.00999999977 : f32
    %76 = arith.mulf %cst_33, %73 : f32
    %77 = arith.addf %38, %76 : f32
    %c0_34 = arith.constant 0 : index
    %c0_35 = arith.constant 0 : index
    %c0_36 = arith.constant 0 : index
    %c0_37 = arith.constant 0 : index
    %78 = vector.load %arg6[%c0_34, %c0_35, %c0_36, %c0_37] : memref<2x2x1x16xf32, #tpu.memory_space<vmem>>, vector<2x2x1x16xf32>
    %c0_38 = arith.constant 0 : index
    %c0_39 = arith.constant 0 : index
    %c0_40 = arith.constant 0 : index
    %c0_41 = arith.constant 0 : index
    %79 = vector.load %arg7[%c0_38, %c0_39, %c0_40, %c0_41] : memref<2x2x1x16xf32, #tpu.memory_space<vmem>>, vector<2x2x1x16xf32>
    %c0_42 = arith.constant 0 : index
    %c0_43 = arith.constant 0 : index
    %c0_44 = arith.constant 0 : index
    %c0_45 = arith.constant 0 : index
    %80 = vector.load %arg8[%c0_42, %c0_43, %c0_44, %c0_45] : memref<2x2x1x16xf32, #tpu.memory_space<vmem>>, vector<2x2x1x16xf32>
    %81 = math.exp %79 : vector<2x2x1x16xf32>
    %cst_46 = arith.constant 1.000000e-03 : f32
    %82 = vector.broadcast %cst_46 : f32 to vector<2x2x1x16xf32>
    %83 = arith.addf %81, %82 : vector<2x2x1x16xf32>
    %84 = vector.extract_strided_slice %83 {offsets = [0, 0, 0, 0], sizes = [2, 1, 1, 16], strides = [1, 1, 1, 1]} : vector<2x2x1x16xf32> to vector<2x1x1x16xf32>
    %85 = vector.shape_cast %84 : vector<2x1x1x16xf32> to vector<2x1x16xf32>
    %86 = vector.extract_strided_slice %83 {offsets = [0, 1, 0, 0], sizes = [2, 1, 1, 16], strides = [1, 1, 1, 1]} : vector<2x2x1x16xf32> to vector<2x1x1x16xf32>
    %87 = vector.shape_cast %86 : vector<2x1x1x16xf32> to vector<2x1x16xf32>
    %88 = arith.mulf %85, %87 : vector<2x1x16xf32>
    %89 = math.log %88 : vector<2x1x16xf32>
    %90 = vector.extract_strided_slice %80 {offsets = [0, 0, 0, 0], sizes = [2, 1, 1, 16], strides = [1, 1, 1, 1]} : vector<2x2x1x16xf32> to vector<2x1x1x16xf32>
    %91 = vector.shape_cast %90 : vector<2x1x1x16xf32> to vector<2x1x16xf32>
    %92 = vector.extract_strided_slice %78 {offsets = [0, 0, 0, 0], sizes = [2, 1, 1, 16], strides = [1, 1, 1, 1]} : vector<2x2x1x16xf32> to vector<2x1x1x16xf32>
    %93 = vector.shape_cast %92 : vector<2x1x1x16xf32> to vector<2x1x16xf32>
    %94 = arith.subf %91, %93 : vector<2x1x16xf32>
    %95 = vector.extract_strided_slice %80 {offsets = [0, 1, 0, 0], sizes = [2, 1, 1, 16], strides = [1, 1, 1, 1]} : vector<2x2x1x16xf32> to vector<2x1x1x16xf32>
    %96 = vector.shape_cast %95 : vector<2x1x1x16xf32> to vector<2x1x16xf32>
    %97 = vector.extract_strided_slice %78 {offsets = [0, 1, 0, 0], sizes = [2, 1, 1, 16], strides = [1, 1, 1, 1]} : vector<2x2x1x16xf32> to vector<2x1x1x16xf32>
    %98 = vector.shape_cast %97 : vector<2x1x1x16xf32> to vector<2x1x16xf32>
    %99 = arith.subf %96, %98 : vector<2x1x16xf32>
    %100 = arith.mulf %94, %94 : vector<2x1x16xf32>
    %101 = arith.mulf %100, %87 : vector<2x1x16xf32>
    %102 = arith.mulf %99, %99 : vector<2x1x16xf32>
    %103 = arith.mulf %102, %85 : vector<2x1x16xf32>
    %104 = arith.addf %101, %103 : vector<2x1x16xf32>
    %105 = arith.divf %104, %88 : vector<2x1x16xf32>
    %106 = math.sqrt %105 : vector<2x1x16xf32>
    %107 = arith.addf %89, %106 : vector<2x1x16xf32>
    %cst_47 = arith.constant dense<0.000000e+00> : vector<1x16xf32>
    %108 = vector.multi_reduction <add>, %107, %cst_47 [0] : vector<2x1x16xf32> to vector<1x16xf32>
    %109 = vector.shape_cast %108 : vector<1x16xf32> to vector<1x1x16xf32>
    %cst_48 = arith.constant dense<0.000000e+00> : vector<1xf32>
    %110 = vector.multi_reduction <add>, %109, %cst_48 [1, 2] : vector<1x1x16xf32> to vector<1xf32>
    %111 = vector.shape_cast %110 : vector<1xf32> to vector<1x1x1xf32>
    %112 = vector.extract %111[0, 0, 0] : f32 from vector<1x1x1xf32>
    %cst_49 = arith.constant 3.125000e-02 : f32
    %113 = arith.mulf %112, %cst_49 : f32
    %c2 = arith.constant 2 : index
    %114 = memref.load %arg15[%c2] : memref<6xf32, #tpu.memory_space<smem>>
    memref.store %113, %arg15[%c2] : memref<6xf32, #tpu.memory_space<smem>>
    %cst_50 = arith.constant 2.000000e-02 : f32
    %115 = arith.mulf %cst_50, %112 : f32
    %116 = arith.addf %77, %115 : f32
    %c0_51 = arith.constant 0 : index
    %c0_52 = arith.constant 0 : index
    %c0_53 = arith.constant 0 : index
    %c0_54 = arith.constant 0 : index
    %117 = vector.load %arg9[%c0_51, %c0_52, %c0_53, %c0_54] : memref<2x2x1x4xf32, #tpu.memory_space<vmem>>, vector<2x2x1x4xf32>
    %c0_55 = arith.constant 0 : index
    %c0_56 = arith.constant 0 : index
    %c0_57 = arith.constant 0 : index
    %c0_58 = arith.constant 0 : index
    %118 = vector.load %arg10[%c0_55, %c0_56, %c0_57, %c0_58] : memref<2x2x1x4xf32, #tpu.memory_space<vmem>>, vector<2x2x1x4xf32>
    %c0_59 = arith.constant 0 : index
    %c0_60 = arith.constant 0 : index
    %c0_61 = arith.constant 0 : index
    %c0_62 = arith.constant 0 : index
    %119 = vector.load %arg11[%c0_59, %c0_60, %c0_61, %c0_62] : memref<2x2x1x4xf32, #tpu.memory_space<vmem>>, vector<2x2x1x4xf32>
    %120 = math.exp %118 : vector<2x2x1x4xf32>
    %cst_63 = arith.constant 1.000000e-03 : f32
    %121 = vector.broadcast %cst_63 : f32 to vector<2x2x1x4xf32>
    %122 = arith.addf %120, %121 : vector<2x2x1x4xf32>
    %123 = vector.extract_strided_slice %122 {offsets = [0, 0, 0, 0], sizes = [2, 1, 1, 4], strides = [1, 1, 1, 1]} : vector<2x2x1x4xf32> to vector<2x1x1x4xf32>
    %124 = vector.shape_cast %123 : vector<2x1x1x4xf32> to vector<2x1x4xf32>
    %125 = vector.extract_strided_slice %122 {offsets = [0, 1, 0, 0], sizes = [2, 1, 1, 4], strides = [1, 1, 1, 1]} : vector<2x2x1x4xf32> to vector<2x1x1x4xf32>
    %126 = vector.shape_cast %125 : vector<2x1x1x4xf32> to vector<2x1x4xf32>
    %127 = arith.mulf %124, %126 : vector<2x1x4xf32>
    %128 = math.log %127 : vector<2x1x4xf32>
    %129 = vector.extract_strided_slice %119 {offsets = [0, 0, 0, 0], sizes = [2, 1, 1, 4], strides = [1, 1, 1, 1]} : vector<2x2x1x4xf32> to vector<2x1x1x4xf32>
    %130 = vector.shape_cast %129 : vector<2x1x1x4xf32> to vector<2x1x4xf32>
    %131 = vector.extract_strided_slice %117 {offsets = [0, 0, 0, 0], sizes = [2, 1, 1, 4], strides = [1, 1, 1, 1]} : vector<2x2x1x4xf32> to vector<2x1x1x4xf32>
    %132 = vector.shape_cast %131 : vector<2x1x1x4xf32> to vector<2x1x4xf32>
    %133 = arith.subf %130, %132 : vector<2x1x4xf32>
    %134 = vector.extract_strided_slice %119 {offsets = [0, 1, 0, 0], sizes = [2, 1, 1, 4], strides = [1, 1, 1, 1]} : vector<2x2x1x4xf32> to vector<2x1x1x4xf32>
    %135 = vector.shape_cast %134 : vector<2x1x1x4xf32> to vector<2x1x4xf32>
    %136 = vector.extract_strided_slice %117 {offsets = [0, 1, 0, 0], sizes = [2, 1, 1, 4], strides = [1, 1, 1, 1]} : vector<2x2x1x4xf32> to vector<2x1x1x4xf32>
    %137 = vector.shape_cast %136 : vector<2x1x1x4xf32> to vector<2x1x4xf32>
    %138 = arith.subf %135, %137 : vector<2x1x4xf32>
    %139 = arith.mulf %133, %133 : vector<2x1x4xf32>
    %140 = arith.mulf %139, %126 : vector<2x1x4xf32>
    %141 = arith.mulf %138, %138 : vector<2x1x4xf32>
    %142 = arith.mulf %141, %124 : vector<2x1x4xf32>
    %143 = arith.addf %140, %142 : vector<2x1x4xf32>
    %144 = arith.divf %143, %127 : vector<2x1x4xf32>
    %145 = math.sqrt %144 : vector<2x1x4xf32>
    %146 = arith.addf %128, %145 : vector<2x1x4xf32>
    %cst_64 = arith.constant dense<0.000000e+00> : vector<1x4xf32>
    %147 = vector.multi_reduction <add>, %146, %cst_64 [0] : vector<2x1x4xf32> to vector<1x4xf32>
    %148 = vector.shape_cast %147 : vector<1x4xf32> to vector<1x1x4xf32>
    %cst_65 = arith.constant dense<0.000000e+00> : vector<1xf32>
    %149 = vector.multi_reduction <add>, %148, %cst_65 [1, 2] : vector<1x1x4xf32> to vector<1xf32>
    %150 = vector.shape_cast %149 : vector<1xf32> to vector<1x1x1xf32>
    %151 = vector.extract %150[0, 0, 0] : f32 from vector<1x1x1xf32>
    %cst_66 = arith.constant 1.250000e-01 : f32
    %152 = arith.mulf %151, %cst_66 : f32
    %c3 = arith.constant 3 : index
    %153 = memref.load %arg15[%c3] : memref<6xf32, #tpu.memory_space<smem>>
    memref.store %152, %arg15[%c3] : memref<6xf32, #tpu.memory_space<smem>>
    %cst_67 = arith.constant 8.000000e-02 : f32
    %154 = arith.mulf %cst_67, %151 : f32
    %155 = arith.addf %116, %154 : f32
    %c0_68 = arith.constant 0 : index
    %c0_69 = arith.constant 0 : index
    %c0_70 = arith.constant 0 : index
    %c0_71 = arith.constant 0 : index
    %156 = vector.load %arg12[%c0_68, %c0_69, %c0_70, %c0_71] : memref<2x2x1x1xf32, #tpu.memory_space<vmem>>, vector<2x2x1x1xf32>
    %c0_72 = arith.constant 0 : index
    %c0_73 = arith.constant 0 : index
    %c0_74 = arith.constant 0 : index
    %c0_75 = arith.constant 0 : index
    %157 = vector.load %arg13[%c0_72, %c0_73, %c0_74, %c0_75] : memref<2x2x1x1xf32, #tpu.memory_space<vmem>>, vector<2x2x1x1xf32>
    %c0_76 = arith.constant 0 : index
    %c0_77 = arith.constant 0 : index
    %c0_78 = arith.constant 0 : index
    %c0_79 = arith.constant 0 : index
    %158 = vector.load %arg14[%c0_76, %c0_77, %c0_78, %c0_79] : memref<2x2x1x1xf32, #tpu.memory_space<vmem>>, vector<2x2x1x1xf32>
    %159 = math.exp %157 : vector<2x2x1x1xf32>
    %cst_80 = arith.constant 1.000000e-03 : f32
    %160 = vector.broadcast %cst_80 : f32 to vector<2x2x1x1xf32>
    %161 = arith.addf %159, %160 : vector<2x2x1x1xf32>
    %162 = vector.extract_strided_slice %161 {offsets = [0, 0, 0, 0], sizes = [2, 1, 1, 1], strides = [1, 1, 1, 1]} : vector<2x2x1x1xf32> to vector<2x1x1x1xf32>
    %163 = vector.shape_cast %162 : vector<2x1x1x1xf32> to vector<2x1x1xf32>
    %164 = vector.extract_strided_slice %161 {offsets = [0, 1, 0, 0], sizes = [2, 1, 1, 1], strides = [1, 1, 1, 1]} : vector<2x2x1x1xf32> to vector<2x1x1x1xf32>
    %165 = vector.shape_cast %164 : vector<2x1x1x1xf32> to vector<2x1x1xf32>
    %166 = arith.mulf %163, %165 : vector<2x1x1xf32>
    %167 = math.log %166 : vector<2x1x1xf32>
    %168 = vector.extract_strided_slice %158 {offsets = [0, 0, 0, 0], sizes = [2, 1, 1, 1], strides = [1, 1, 1, 1]} : vector<2x2x1x1xf32> to vector<2x1x1x1xf32>
    %169 = vector.shape_cast %168 : vector<2x1x1x1xf32> to vector<2x1x1xf32>
    %170 = vector.extract_strided_slice %156 {offsets = [0, 0, 0, 0], sizes = [2, 1, 1, 1], strides = [1, 1, 1, 1]} : vector<2x2x1x1xf32> to vector<2x1x1x1xf32>
    %171 = vector.shape_cast %170 : vector<2x1x1x1xf32> to vector<2x1x1xf32>
    %172 = arith.subf %169, %171 : vector<2x1x1xf32>
    %173 = vector.extract_strided_slice %158 {offsets = [0, 1, 0, 0], sizes = [2, 1, 1, 1], strides = [1, 1, 1, 1]} : vector<2x2x1x1xf32> to vector<2x1x1x1xf32>
    %174 = vector.shape_cast %173 : vector<2x1x1x1xf32> to vector<2x1x1xf32>
    %175 = vector.extract_strided_slice %156 {offsets = [0, 1, 0, 0], sizes = [2, 1, 1, 1], strides = [1, 1, 1, 1]} : vector<2x2x1x1xf32> to vector<2x1x1x1xf32>
    %176 = vector.shape_cast %175 : vector<2x1x1x1xf32> to vector<2x1x1xf32>
    %177 = arith.subf %174, %176 : vector<2x1x1xf32>
    %178 = arith.mulf %172, %172 : vector<2x1x1xf32>
    %179 = arith.mulf %178, %165 : vector<2x1x1xf32>
    %180 = arith.mulf %177, %177 : vector<2x1x1xf32>
    %181 = arith.mulf %180, %163 : vector<2x1x1xf32>
    %182 = arith.addf %179, %181 : vector<2x1x1xf32>
    %183 = arith.divf %182, %166 : vector<2x1x1xf32>
    %184 = math.sqrt %183 : vector<2x1x1xf32>
    %185 = arith.addf %167, %184 : vector<2x1x1xf32>
    %cst_81 = arith.constant dense<0.000000e+00> : vector<1x1xf32>
    %186 = vector.multi_reduction <add>, %185, %cst_81 [0] : vector<2x1x1xf32> to vector<1x1xf32>
    %187 = vector.shape_cast %186 : vector<1x1xf32> to vector<1x1x1xf32>
    %cst_82 = arith.constant dense<0.000000e+00> : vector<1xf32>
    %188 = vector.multi_reduction <add>, %187, %cst_82 [1, 2] : vector<1x1x1xf32> to vector<1xf32>
    %189 = vector.shape_cast %188 : vector<1xf32> to vector<1x1x1xf32>
    %190 = vector.extract %189[0, 0, 0] : f32 from vector<1x1x1xf32>
    %cst_83 = arith.constant 5.000000e-01 : f32
    %191 = arith.mulf %190, %cst_83 : f32
    %c4 = arith.constant 4 : index
    %192 = memref.load %arg15[%c4] : memref<6xf32, #tpu.memory_space<smem>>
    memref.store %191, %arg15[%c4] : memref<6xf32, #tpu.memory_space<smem>>
    %cst_84 = arith.constant 3.200000e-01 : f32
    %193 = arith.mulf %cst_84, %190 : f32
    %194 = arith.addf %155, %193 : f32
    %c5 = arith.constant 5 : index
    %195 = memref.load %arg15[%c5] : memref<6xf32, #tpu.memory_space<smem>>
    memref.store %194, %arg15[%c5] : memref<6xf32, #tpu.memory_space<smem>>
    return
  }
}

</mosaic_0001>

<bundles_post_ra>
// kernel: tpu_custom_call.1
= control target key start
LH: loop header
LB: loop body
LE: loop exit
PB: predicated region body
PF: predicated region fallthrough
CT: control target
= control target key end

     0   :  { %20 = vsyncpa [#allocation3], 0  ;;  %s1635_s0 = inlined_call_operand.vmem [shape: f32[2,2,2,128], index: 0, kind: input, shape index: {}]   ;;  %s1636_s1 = inlined_call_operand.hbm [shape: f32[2,2,2,128], index: 1, kind: input, shape index: {}]   ;;  %s1637_s2 = inlined_call_operand.hbm [shape: f32[2,2,2,128], index: 2, kind: input, shape index: {}]   ;;  %s1638_s3 = inlined_call_operand.vmem [shape: f32[2,2,1,64], index: 3, kind: input, shape index: {}]   ;;  %s1639_s4 = inlined_call_operand.hbm [shape: f32[2,2,1,64], index: 4, kind: input, shape index: {}]   ;;  %s1640_s5 = inlined_call_operand.hbm [shape: f32[2,2,1,64], index: 5, kind: input, shape index: {}]   ;;  %s1641_s6 = inlined_call_operand.hbm [shape: f32[2,2,1,16], index: 6, kind: input, shape index: {}]   ;;  %s1642_s7 = inlined_call_operand.vmem [shape: f32[2,2,1,16], index: 7, kind: input, shape index: {}]   ;;  %s1643_s8 = inlined_call_operand.hbm [shape: f32[2,2,1,16], index: 8, kind: input, shape index: {}]   ;;  %s1644_s9 = inlined_call_operand.hbm [shape: f32[2,2,1,4], index: 9, kind: input, shape index: {}]   ;;  %s1645_s10 = inlined_call_operand.hbm [shape: f32[2,2,1,4], index: 10, kind: input, shape index: {}]   ;;  %s1646_s11 = inlined_call_operand.vmem [shape: f32[2,2,1,4], index: 11, kind: input, shape index: {}]   ;;  %s1647_s12 = inlined_call_operand.vmem [shape: f32[2,2,1,1], index: 12, kind: input, shape index: {}]   ;;  %s1648_s13 = inlined_call_operand.vmem [shape: f32[2,2,1,1], index: 13, kind: input, shape index: {}]   ;;  %s1649_s14 = inlined_call_operand.vmem [shape: f32[2,2,1,1], index: 14, kind: input, shape index: {}]   ;;  %s1650_s15 = inlined_call_operand.hbm [shape: f32[6], index: 15, kind: output, shape index: {}]  }
   0x1   :  { %21 = vsyncpa [#allocation6], 0 }
   0x2   :  { %22 = vsyncpa [#allocation9], 0 }
   0x3   :  { %23 = vsyncpa [#allocation12], 0 }
   0x4   :  { %24 = vsyncpa [#allocation15], 0 }
   0x5   :  { %25 = vsyncpa [#allocation4], 0  ;;  %s45_s20 = sshll.u32 %s1637_s2, 4  ;;  %s1124_s21 = smov [#allocation5]   ;;  %s46_s20 = int_to_ptr.hbm [resolvable:$true] %s45_s20 }
   0x6   :  { %s47_s22 = sshll.u32 %s1124_s21, 4  ;;  %s1125_s23 = smov 32   ;;  %s48_s22 = int_to_ptr.vmem [resolvable:$true] %s47_s22 }
   0x7   :  { %s1126_s24 = smov 2   ;;  %s73_s27 = sshll.u32 %s1640_s5, 4  ;;  %s74_s27 = int_to_ptr.hbm [resolvable:$true] %s73_s27 }
   0x8   :  { %53 = dma.hbm_to_vmem [thread:$0]  %s46_s20, 128, %s48_s22, [#allocation6], %s1125_s23, %s1125_s23, %s1126_s24  }
   0x9   :  { %s1127_s28 = smov [#allocation8]   ;;  %s101_s17 = sshll.u32 %s1643_s8, 4  ;;  %s102_s17 = int_to_ptr.hbm [resolvable:$true] %s101_s17 }
   0xa   :  { %s75_s29 = sshll.u32 %s1127_s28, 4  ;;  %s1128_s2 = smov 16   ;;  %s76_s29 = int_to_ptr.vmem [resolvable:$true] %s75_s29 }
   0xb   :  { %s1129_s18 = smov 1   ;;  %s32_s21 = sshll.u32 %s1636_s1, 4  ;;  %s33_s21 = int_to_ptr.hbm [resolvable:$true] %s32_s21 }
   0xc   :  { %81 = dma.hbm_to_vmem [thread:$0]  %s74_s27, 64, %s76_s29, [#allocation9], %s1128_s2, %s1128_s2, %s1129_s18  }
   0xd   :  { %s1130_s5 = smov [#allocation11]   ;;  %s1131_s8 = smov [#allocation2]  }
   0xe   :  { %s103_s22 = sshll.u32 %s1130_s5, 4  ;;  %s34_s25 = sshll.u32 %s1131_s8, 4  ;;  %s104_s22 = int_to_ptr.vmem [resolvable:$true] %s103_s22  ;;  %s35_s25 = int_to_ptr.vmem [resolvable:$true] %s34_s25 }
   0xf   :  { %109 = dma.hbm_to_vmem [thread:$0]  %s102_s17, 64, %s104_s22, [#allocation12], %s1128_s2, %s1128_s2, %s1129_s18  }
  0x10   :  { %s60_s30 = sshll.u32 %s1639_s4, 4  ;;  %s86_s1 = sshll.u32 %s1641_s6, 4  ;;  %s61_s30 = int_to_ptr.hbm [resolvable:$true] %s60_s30  ;;  %s87_s1 = int_to_ptr.hbm [resolvable:$true] %s86_s1 }
  0x11   :  { %40 = dma.hbm_to_vmem [thread:$0]  %s33_s21, 128, %s35_s25, [#allocation3], %s1125_s23, %s1125_s23, %s1126_s24  }
  0x12   :  { %s1132_s16 = smov [#allocation7]   ;;  %s1133_s17 = smov [#allocation10]  }
  0x13   :  { %s62_s19 = sshll.u32 %s1132_s16, 4  ;;  %s88_s20 = sshll.u32 %s1133_s17, 4  ;;  %s63_s19 = int_to_ptr.vmem [resolvable:$true] %s62_s19  ;;  %s89_s20 = int_to_ptr.vmem [resolvable:$true] %s88_s20 }
  0x14   :  { %68 = dma.hbm_to_vmem [thread:$0]  %s61_s30, 64, %s63_s19, [#allocation6], %s1128_s2, %s1128_s2, %s1129_s18  }
  0x15   :  { %s114_s4 = sshll.u32 %s1644_s9, 4  ;;  %s127_s24 = sshll.u32 %s1645_s10, 4  ;;  %s115_s4 = int_to_ptr.hbm [resolvable:$true] %s114_s4  ;;  %s128_s24 = int_to_ptr.hbm [resolvable:$true] %s127_s24 }
  0x16   :  { %94 = dma.hbm_to_vmem [thread:$0]  %s87_s1, 64, %s89_s20, [#allocation9], %s1128_s2, %s1128_s2, %s1129_s18  }
  0x17   :  { %s1134_s21 = smov [#allocation13]   ;;  %s1135_s25 = smov [#allocation14]  }
  0x18   :  { %s116_s8 = sshll.u32 %s1134_s21, 4  ;;  %s129_s9 = sshll.u32 %s1135_s25, 4  ;;  %s117_s8 = int_to_ptr.vmem [resolvable:$true] %s116_s8  ;;  %s130_s9 = int_to_ptr.vmem [resolvable:$true] %s129_s9 }
  0x19   :  { %122 = dma.hbm_to_vmem [thread:$0]  %s115_s4, 64, %s117_s8, [#allocation12], %s1128_s2, %s1128_s2, %s1129_s18  }
  0x1a   :  { %135 = dma.hbm_to_vmem [thread:$0]  %s128_s24, 64, %s130_s9, [#allocation15], %s1128_s2, %s1128_s2, %s1129_s18  }
  0x1b   :  { %1112 = dma.done.wait [#allocation3], 128  }
  0x1c   :  { %1113 = vsyncadd [#allocation3], 4294967168 }
  0x1d   :  { %1114 = dma.done.wait [#allocation6], 192  }
  0x1e   :  { %1115 = vsyncadd [#allocation6], 4294967104 }
  0x1f   :  { %1116 = dma.done.wait [#allocation9], 128  }
  0x20   :  { %1117 = vsyncadd [#allocation9], 4294967168 }
  0x21   :  { %1118 = dma.done.wait [#allocation12], 128  }
  0x22   :  { %1119 = vsyncadd [#allocation12], 4294967168 }
  0x23   :  { %1120 = dma.done.wait [#allocation15], 64  }
  0x24   :  { %1121 = vsyncadd [#allocation15], 4294967232  ;;  %v418_v0 = vld [vmem:[%s1642_s7] sm:$0x1]  ;;  %v419_v1 = vld [vmem:[%s1642_s7 + $0x1] sm:$0x1] }
  0x25   :  { %v420_v2 = vld [vmem:[%s1642_s7 + $0x2] sm:$0x1]  ;;  %v421_v3 = vld [vmem:[%s1642_s7 + $0x3] sm:$0x1]  ;;  %v426_v4 = vmul.f32 1.442695, %v418_v0 }
  0x26   :  { %v428_v5 = vmul.f32 1.442695, %v419_v1  ;;  %v430_v6 = vmul.f32 1.442695, %v420_v2  ;;  %v432_v7 = vmul.f32 1.442695, %v421_v3 }
  0x27   :  { %808 = vpow2.f32 %v426_v4  ;;  %v180_v8 = vld [vmem:[#allocation2] sm:$0x3]  ;;  %v181_v9 = vld [vmem:[#allocation2 + $0x2] sm:$0x3]  ;;  %v182_v10 = vld [vmem:[#allocation2 + $0x4] sm:$0x3] }
  0x28   :  { %810 = vpow2.f32 %v428_v5  ;;  %v183_v11 = vld [vmem:[#allocation2 + $0x6] sm:$0x3]  ;;  %v414_v12 = vld [vmem:[#allocation10] sm:$0x1]  ;;  %v415_v13 = vld [vmem:[#allocation10 + $0x1] sm:$0x1] }
  0x29   :  { %v417_v14 = vld [vmem:[#allocation10 + $0x3] sm:$0x1]  ;;  %v422_v15 = vld [vmem:[#allocation11] sm:$0x1]  ;;  %812 = vpow2.f32 %v430_v6  ;;  %v423_v16 = vld [vmem:[#allocation11 + $0x1] sm:$0x1] }
  0x2a   :  { %814 = vpow2.f32 %v432_v7  ;;  %v188_v17 = vmul.f32 1.442695, %v180_v8  ;;  %v190_v18 = vmul.f32 1.442695, %v181_v9  ;;  %v425_v19 = vld [vmem:[#allocation11 + $0x3] sm:$0x1]  ;;  %v446_v25 = vsub.f32 %v423_v16, %v415_v13 }
  0x2b   :  { %v192_v20 = vmul.f32 1.442695, %v182_v10  ;;  %v194_v21 = vmul.f32 1.442695, %v183_v11  ;;  %v416_v22 = vld [vmem:[#allocation10 + $0x2] sm:$0x1]  ;;  %v444_v30 = vsub.f32 %v422_v15, %v414_v12  ;;  %v447_v31 = vsub.f32 %v425_v19, %v417_v14 }
  0x2c   :  { %v424_v23 = vld [vmem:[#allocation11 + $0x2] sm:$0x1]  ;;  %816 = vpow2.f32 %v188_v17  ;;  %v176_v26 = vld [vmem:[%s1635_s0] sm:$0x3]  ;;  %v184_v27 = vld [vmem:[#allocation5] sm:$0x3]  ;;  %v452_v45 = vmul.f32 %v446_v25, %v446_v25 }
  0x2d   :  { %v809_v24 = vpop.eup %808  ;;  %818 = vpow2.f32 %v190_v18  ;;  %v178_v32 = vld [vmem:[%s1635_s0 + $0x4] sm:$0x3]  ;;  %v186_v33 = vld [vmem:[#allocation5 + $0x4] sm:$0x3]  ;;  %v445_v36 = vsub.f32 %v424_v23, %v416_v22  ;;  %v177_v37 = vld [vmem:[%s1635_s0 + $0x2] sm:$0x3]  ;;  %v206_v42 = vsub.f32 %v184_v27, %v176_v26  ;;  %v448_v50 = vmul.f32 %v444_v30, %v444_v30 }
  0x2e   :  { %v811_v28 = vpop.eup %810  ;;  %v434_v29 = vadd.f32 0.001, %v809_v24  ;;  %820 = vpow2.f32 %v192_v20  ;;  %v179_v40 = vld [vmem:[%s1635_s0 + $0x6] sm:$0x3]  ;;  %v185_v41 = vld [vmem:[#allocation5 + $0x2] sm:$0x3]  ;;  %v207_v47 = vsub.f32 %v186_v33, %v178_v32  ;;  %v453_v51 = vmul.f32 %v447_v31, %v447_v31 }
  0x2f   :  { %v813_v34 = vpop.eup %812  ;;  %v435_v35 = vadd.f32 0.001, %v811_v28  ;;  %822 = vpow2.f32 %v194_v21  ;;  %v187_v46 = vld [vmem:[#allocation5 + $0x6] sm:$0x3]  ;;  %v537_v48 = vld [vmem:[#allocation14] sm:$0x1]  ;;  %v449_v55 = vmul.f32 %v445_v36, %v445_v36  ;;  %v208_v56 = vsub.f32 %v185_v41, %v177_v37 }
  0x30   :  { %v815_v38 = vpop.eup %814  ;;  %v436_v39 = vadd.f32 0.001, %v813_v34  ;;  %v538_v52 = vld [vmem:[#allocation14 + $0x1] sm:$0x1]  ;;  %v539_v57 = vld [vmem:[#allocation14 + $0x2] sm:$0x1]  ;;  %v209_v59 = vsub.f32 %v187_v46, %v179_v40  ;;  %v210_v60 = vmul.f32 %v206_v42, %v206_v42  ;;  %v454_v63 = vmul.f32 %v452_v45, %v434_v29 }
  0x31   :  { %v437_v43 = vadd.f32 0.001, %v815_v38  ;;  %v1283_v44 = vmul.f32 %v435_v35, %v434_v29  ;;  %v545_v61 = vmul.f32 1.442695, %v537_v48  ;;  %v211_v0 = vmul.f32 %v207_v47, %v207_v47  ;;  %v540_v26 = vld [vmem:[#allocation14 + $0x3] sm:$0x1] }
  0x32   :  { %v817_v49 = vpop.eup %816  ;;  %v547_v1 = vmul.f32 1.442695, %v538_v52  ;;  %v450_v2 = vmul.f32 %v448_v50, %v435_v35  ;;  %v455_v3 = vmul.f32 %v453_v51, %v436_v39  ;;  %v549_v4 = vmul.f32 1.442695, %v539_v57  ;;  %v533_v29 = vld [vmem:[#allocation13] sm:$0x1] }
  0x33   :  { %v819_v53 = vpop.eup %818  ;;  %v1285_v54 = vmul.f32 %v437_v43, %v436_v39  ;;  %824 = vrcp.f32 %v1283_v44  ;;  %v451_v5 = vmul.f32 %v449_v55, %v437_v43  ;;  %v467_v6 = vand.u32 2147483647, %v1283_v44  ;;  %v541_v30 = vld [vmem:[%s1646_s11] sm:$0x1]  ;;  %s770_s27 = sshll.u32 %s1650_s15, 4  ;;  %s1136_s23 = smov [#allocation16]   ;;  %s771_s27 = int_to_ptr.hbm [resolvable:$true] %s770_s27 }
  0x34   :  { %v821_v58 = vpop.eup %820  ;;  %826 = vlog2.f32 %v1283_v44  ;;  %v196_v7 = vadd.f32 0.001, %v817_v49  ;;  %v197_v8 = vadd.f32 0.001, %v819_v53  ;;  %v469_v9 = vand.u32 2147483648, %v1283_v44 }
  0x35   :  { %v823_v62 = vpop.eup %822  ;;  %828 = vrcp.f32 %v1285_v54  ;;  %v198_v10 = vadd.f32 0.001, %v821_v58  ;;  %v214_v13 = vmul.f32 %v208_v56, %v208_v56  ;;  %v215_v14 = vmul.f32 %v209_v59, %v209_v59 }
  0x36   :  { %v199_v11 = vadd.f32 0.001, %v823_v62  ;;  %830 = vpow2.f32 %v545_v61  ;;  %v1293_v12 = vmul.f32 %v197_v8, %v196_v7  ;;  %v456_v16 = vadd.f32 %v454_v63, %v450_v2 }
  0x37   :  { %832 = vlog2.f32 %v1285_v54  ;;  %v482_v17 = vand.u32 2147483647, %v1285_v54  ;;  %v1298_v20 = vadd.f32 %v455_v3, %v451_v5  ;;  %vm463_vm0 = vweird.f32 %v1283_v44  ;;  %v535_v5 = vld [vmem:[#allocation13 + $0x2] sm:$0x1] }
  0x38   :  { %v1296_v18 = vmul.f32 %v199_v11, %v198_v10  ;;  %834 = vpow2.f32 %v547_v1  ;;  %v484_v22 = vand.u32 2147483648, %v1285_v54  ;;  %vm1303_vm1 = vcmp.eq.f32.partialorder %v467_v6, 8.507059e+37  ;;  %v534_v1 = vld [vmem:[#allocation13 + $0x1] sm:$0x1] }
  0x39   :  { %v825_v15 = vpop.eup %824  ;;  %v470_v25 = vor.u32 1.1754944e-38, %v469_v9  ;;  %vm478_vm2 = vweird.f32 %v1285_v54  ;;  %836 = vpow2.f32 %v549_v4  ;;  %vm1313_vm4 = vcmp.eq.f32.partialorder %v482_v17, 8.507059e+37  ;;  %v536_v9 = vld [vmem:[#allocation13 + $0x3] sm:$0x1] }
  0x3a   :  { %v827_v19 = vpop.eup %826  ;;  %v459_v21 = vmul.f32 %v825_v15, %v1283_v44  ;;  %vm464_vm3 = vweird.f32 %v825_v15  ;;  %838 = vrcp.f32 %v1293_v12  ;;  %v212_v33 = vmul.f32 %v210_v60, %v197_v8  ;;  %v544_v17 = vld [vmem:[%s1646_s11 + $0x3] sm:$0x1] }
  0x3b   :  { %v829_v23 = vpop.eup %828  ;;  %v216_v34 = vmul.f32 %v214_v13, %v196_v7  ;;  %840 = vrcp.f32 %v1296_v18  ;;  %v485_v38 = vor.u32 1.1754944e-38, %v484_v22  ;;  %v1318_v40 = vmul.f32 0.6931472, %v827_v19  ;;  %vm1323_vm6 = vmor %vm463_vm0, %vm464_vm3 }
  0x3c   :  { %v460_v27 = vsub.f32 1.0, %v459_v21  ;;  %v474_v28 = vmul.f32 %v829_v23, %v1285_v54  ;;  %v831_v31 = vpop.eup %830  ;;  %vm479_vm5 = vweird.f32 %v829_v23  ;;  %v213_v42 = vmul.f32 %v211_v0, %v199_v11 }
  0x3d   :  { %v833_v35 = vpop.eup %832  ;;  %v551_v43 = vmul.f32 1.442695, %v540_v26  ;;  %v1327_v45 = vsub.f32 %v541_v30, %v533_v29  ;;  %842 = vlog2.f32 %v1293_v12  ;;  %v217_v48 = vmul.f32 %v215_v14, %v198_v10  ;;  %vm1334_vm7 = vmor %vm478_vm2, %vm479_vm5  ;;  %v542_v10 = vld [vmem:[%s1646_s11 + $0x1] sm:$0x1] }
  0x3e   :  { %v461_v36 = vmul.f32 %v825_v15, %v460_v27  ;;  %v475_v37 = vsub.f32 1.0, %v474_v28  ;;  %v835_v39 = vpop.eup %834  ;;  %v1330_v50 = vmul.f32 0.6931472, %v833_v35  ;;  %844 = vlog2.f32 %v1296_v18 }
  0x3f   :  { %v837_v49 = vpop.eup %836  ;;  %v218_v51 = vadd.f32 %v216_v34, %v212_v33  ;;  %vm225_vm8 = vweird.f32 %v1293_v12  ;;  %v1342_v56 = vadd.f32 0.001, %v831_v31  ;;  %v1344_v57 = vadd.f32 0.001, %v835_v39 }
  0x40   :  { %v462_v46 = vadd.f32 %v825_v15, %v461_v36  ;;  %v476_v47 = vmul.f32 %v829_v23, %v475_v37  ;;  %v839_v52 = vpop.eup %838  ;;  %v229_v60 = vand.u32 2147483647, %v1293_v12  ;;  %846 = vpow2.f32 %v551_v43 }
  0x41   :  { %v841_v58 = vpop.eup %840  ;;  %v221_v59 = vmul.f32 %v839_v52, %v1293_v12  ;;  %v231_v63 = vand.u32 2147483648, %v1293_v12  ;;  %vm226_vm9 = vweird.f32 %v839_v52  ;;  %v244_v4 = vand.u32 2147483647, %v1296_v18 }
  0x42   :  { %v466_v53 = vsel %vm1323_vm6, %v825_v15, %v462_v46  ;;  %v477_v55 = vadd.f32 %v829_v23, %v476_v47  ;;  %v236_v0 = vmul.f32 %v841_v58, %v1296_v18  ;;  %v246_v8 = vand.u32 2147483648, %v1296_v18  ;;  %vm1382_vm12 = vmor %vm225_vm8, %vm226_vm9 }
  0x43   :  { %v471_v54 = vsel %vm1303_vm1, %v470_v25, %v466_v53  ;;  %v222_v3 = vsub.f32 1.0, %v221_v59  ;;  %v843_v6 = vpop.eup %842  ;;  %v1369_v11 = vmul.f32 %v1344_v57, %v1342_v56  ;;  %vm240_vm10 = vweird.f32 %v1296_v18 }
  0x44   :  { %v1350_v61 = vmul.f32 %v471_v54, %v456_v16  ;;  %v481_v62 = vsel %vm1334_vm7, %v829_v23, %v477_v55  ;;  %v845_v13 = vpop.eup %844  ;;  %v237_v15 = vsub.f32 1.0, %v236_v0  ;;  %vm241_vm11 = vweird.f32 %v841_v58  ;;  %v543_v16 = vld [vmem:[%s1646_s11 + $0x2] sm:$0x1] }
  0x45   :  { %v486_v2 = vsel %vm1313_vm4, %v485_v38, %v481_v62  ;;  %v223_v14 = vmul.f32 %v839_v52, %v222_v3  ;;  %v219_v19 = vadd.f32 %v217_v48, %v213_v42  ;;  %vm1386_vm13 = vcmp.eq.f32.partialorder %v229_v60, 8.507059e+37  ;;  %vm1394_vm15 = vmor %vm240_vm10, %vm241_vm11 }
  0x46   :  { %v1360_v7 = vmul.f32 %v486_v2, %v1298_v20  ;;  %848 = vrsqrt.f32 %v1350_v61  ;;  %v232_v21 = vor.u32 1.1754944e-38, %v231_v63  ;;  %v847_v22 = vpop.eup %846  ;;  %v238_v24 = vmul.f32 %v841_v58, %v237_v15 }
  0x47   :  { %v224_v23 = vadd.f32 %v839_v52, %v223_v14  ;;  %vm1390_vm14 = vcmp.eq.f32.partialorder %v244_v4, 8.507059e+37  ;;  %v565_v26 = vsub.f32 %v542_v10, %v534_v1  ;;  %v247_v12 = vor.u32 1.1754944e-38, %v246_v8 }
  0x48   :  { %850 = vrsqrt.f32 %v1360_v7  ;;  %v564_v28 = vsub.f32 %v543_v16, %v535_v5  ;;  %v566_v29 = vsub.f32 %v544_v17, %v536_v9  ;;  %v1399_v30 = vmul.f32 0.6931472, %v843_v6  ;;  %v299_v17 = vld [vmem:[#allocation7] sm:$0x1] }
  0x49   :  { %852 = vrcp.f32 %v1369_v11  ;;  %v1401_v31 = vmul.f32 0.6931472, %v845_v13  ;;  %v228_v32 = vsel %vm1382_vm12, %v839_v52, %v224_v23  ;;  %v239_v33 = vadd.f32 %v841_v58, %v238_v24 }
  0x4a   :  { %v233_v35 = vsel %vm1386_vm13, %v232_v21, %v228_v32  ;;  %v555_v36 = vadd.f32 0.001, %v837_v49  ;;  %v556_v37 = vadd.f32 0.001, %v847_v22  ;;  %v567_v38 = vmul.f32 %v1327_v45, %v1327_v45 }
  0x4b   :  { %v1410_v41 = vmul.f32 %v233_v35, %v218_v51  ;;  %v243_v42 = vsel %vm1394_vm15, %v841_v58, %v239_v33  ;;  %v571_v43 = vmul.f32 %v565_v26, %v565_v26  ;;  %vm495_vm0 = vcmp.eq.f32.partialorder %v1350_v61, inf }
  0x4c   :  { %v849_v34 = vpop.eup %848  ;;  %v248_v47 = vsel %vm1390_vm14, %v247_v12, %v243_v42  ;;  %v568_v48 = vmul.f32 %v564_v28, %v564_v28  ;;  %v572_v49 = vmul.f32 %v566_v29, %v566_v29  ;;  %vm497_vm1 = vcmp.eq.f32.partialorder %v1350_v61, 0.0 }
  0x4d   :  { %v489_v39 = vmul.f32 %v849_v34, %v1350_v61  ;;  %v1419_v52 = vmul.f32 %v248_v47, %v219_v19  ;;  %854 = vrsqrt.f32 %v1410_v41  ;;  %v498_v53 = vand.u32 2147483648, %v1350_v61 }
  0x4e   :  { %v851_v46 = vpop.eup %850  ;;  %vm507_vm2 = vcmp.eq.f32.partialorder %v1360_v7, inf  ;;  %v1424_v55 = vmul.f32 %v556_v37, %v555_v36  ;;  %v569_v58 = vmul.f32 %v567_v38, %v1344_v57  ;;  %vm509_vm3 = vcmp.eq.f32.partialorder %v1360_v7, 0.0 }
  0x4f   :  { %v490_v44 = vmul.f32 %v849_v34, %v489_v39  ;;  %v501_v45 = vmul.f32 %v851_v46, %v1360_v7  ;;  %v853_v51 = vpop.eup %852  ;;  %856 = vrsqrt.f32 %v1419_v52  ;;  %v573_v60 = vmul.f32 %v571_v43, %v1342_v56 }
  0x50   :  { %v510_v62 = vand.u32 2147483648, %v1360_v7  ;;  %vm514_vm4 = vcmask 122880   ;;  %v570_v63 = vmul.f32 %v568_v48, %v556_v37  ;;  %v574_v0 = vmul.f32 %v572_v49, %v555_v36 }
  0x51   :  { %v491_v54 = vmul.f32 0.5, %v490_v44  ;;  %v502_v59 = vmul.f32 %v851_v46, %v501_v45  ;;  %v578_v1 = vmul.f32 %v853_v51, %v1369_v11  ;;  %vm582_vm5 = vweird.f32 %v1369_v11  ;;  %v300_v45 = vld [vmem:[#allocation7 + $0x1] sm:$0x1] }
  0x52   :  { %v586_v57 = vand.u32 2147483647, %v1369_v11  ;;  %vm583_vm6 = vweird.f32 %v853_v51  ;;  %v588_v5 = vand.u32 2147483648, %v1369_v11  ;;  %858 = vrcp.f32 %v1424_v55 }
  0x53   :  { %v492_v2 = vsub.f32 1.5, %v491_v54  ;;  %v503_v3 = vmul.f32 0.5, %v502_v59  ;;  %v579_v4 = vsub.f32 1.0, %v578_v1  ;;  %v855_v56 = vpop.eup %854  ;;  %v260_v9 = vand.u32 2147483648, %v1410_v41  ;;  %vm1449_vm9 = vmor %vm582_vm5, %vm583_vm6 }
  0x54   :  { %v575_v10 = vadd.f32 %v573_v60, %v569_v58  ;;  %v251_v13 = vmul.f32 %v855_v56, %v1410_v41  ;;  %v1438_v14 = vadd.f32 %v574_v0, %v570_v63  ;;  %vm1440_vm7 = vcmp.eq.f32.partialorder %v586_v57, 8.507059e+37  ;;  %v301_v58 = vld [vmem:[#allocation7 + $0x2] sm:$0x1] }
  0x55   :  { %v493_v6 = vmul.f32 %v849_v34, %v492_v2  ;;  %v504_v8 = vsub.f32 1.5, %v503_v3  ;;  %v580_v15 = vmul.f32 %v853_v51, %v579_v4  ;;  %v857_v19 = vpop.eup %856  ;;  %vm257_vm8 = vcmp.eq.f32.partialorder %v1410_v41, inf }
  0x56   :  { %v589_v22 = vor.u32 1.1754944e-38, %v588_v5  ;;  %vm597_vm10 = vweird.f32 %v1424_v55  ;;  %v252_v23 = vmul.f32 %v855_v56, %v251_v13  ;;  %vm259_vm11 = vcmp.eq.f32.partialorder %v1410_v41, 0.0 }
  0x57   :  { %v494_v20 = vmul.f32 %v493_v6, %v1350_v61  ;;  %v505_v18 = vmul.f32 %v851_v46, %v504_v8  ;;  %v263_v24 = vmul.f32 %v857_v19, %v1419_v52  ;;  %v581_v25 = vadd.f32 %v853_v51, %v580_v15 }
  0x58   :  { %v601_v26 = vand.u32 2147483647, %v1424_v55  ;;  %vm269_vm12 = vcmp.eq.f32.partialorder %v1419_v52, inf  ;;  %v603_v28 = vand.u32 2147483648, %v1424_v55  ;;  %v307_v29 = vmul.f32 1.442695, %v299_v17  ;;  %v859_v32 = vpop.eup %858 }
  0x59   :  { %v496_v27 = vsel %vm495_vm0, %v1350_v61, %v494_v20  ;;  %v506_v12 = vmul.f32 %v505_v18, %v1360_v7  ;;  %v253_v34 = vmul.f32 0.5, %v252_v23  ;;  %v264_v35 = vmul.f32 %v857_v19, %v263_v24 }
  0x5a   :  { %v499_v33 = vsel %vm497_vm1, %v498_v53, %v496_v27  ;;  %v585_v36 = vsel %vm1449_vm9, %v853_v51, %v581_v25  ;;  %v593_v42 = vmul.f32 %v859_v32, %v1424_v55  ;;  %vm598_vm13 = vweird.f32 %v859_v32 }
  0x5b   :  { %v508_v37 = vsel %vm507_vm2, %v1360_v7, %v506_v12  ;;  %v512_v38 = vadd.f32 %v499_v33, %v1318_v40  ;;  %v590_v39 = vsel %vm1440_vm7, %v589_v22, %v585_v36  ;;  %v254_v43 = vsub.f32 1.5, %v253_v34  ;;  %v302_v7 = vld [vmem:[#allocation7 + $0x3] sm:$0x1]  ;;  %vm1491_vm15 = vmor %vm597_vm10, %vm598_vm13  ;;  %v303_v12 = vld [vmem:[#allocation8] sm:$0x1] }
  0x5c   :  { %v511_v61 = vsel %vm509_vm3, %v510_v62, %v508_v37  ;;  %v265_v46 = vmul.f32 0.5, %v264_v35  ;;  %v1476_v47 = vmul.f32 %v590_v39, %v575_v10  ;;  %v594_v44 = vsub.f32 1.0, %v593_v42  ;;  %v306_v34 = vld [vmem:[#allocation8 + $0x3] sm:$0x1] }
  0x5d   :  { %v513_v48 = vadd.f32 %v511_v61, %v1330_v50  ;;  %v515_v49 = vsel %vm514_vm4, %v512_v38, 0.0  ;;  %v255_v40 = vmul.f32 %v855_v56, %v254_v43  ;;  %v272_v53 = vand.u32 2147483648, %v1419_v52  ;;  %v297_v61 = vld [vmem:[%s1638_s3 + $0x2] sm:$0x1]  ;;  %v305_v43 = vld [vmem:[#allocation8 + $0x2] sm:$0x1] }
  0x5e   :  { %v266_v51 = vsub.f32 1.5, %v265_v46  ;;  %860 = vrsqrt.f32 %v1476_v47  ;;  %v595_v59 = vmul.f32 %v859_v32, %v594_v44  ;;  %vm1483_vm14 = vcmp.eq.f32.partialorder %v601_v26, 8.507059e+37  ;;  %v298_v26 = vld [vmem:[%s1638_s3 + $0x3] sm:$0x1] }
  0x5f   :  { %v516_v54 = vsel %vm514_vm4, %v513_v48, 0.0  ;;  %862 = vpow2.f32 %v307_v29  ;;  %v256_v62 = vmul.f32 %v255_v40, %v1410_v41  ;;  %v604_v1 = vor.u32 1.1754944e-38, %v603_v28  ;;  %v304_v28 = vld [vmem:[#allocation8 + $0x1] sm:$0x1] }
  0x60   :  { %v517_v50 = vadd.f32 %v516_v54, %v515_v49  ;;  %v267_v63 = vmul.f32 %v857_v19, %v266_v51  ;;  %v596_v2 = vadd.f32 %v859_v32, %v595_v59  ;;  %v309_v3 = vmul.f32 1.442695, %v300_v45 }
  0x61   :  { %v311_v57 = vmul.f32 1.442695, %v301_v58  ;;  %v313_v4 = vmul.f32 1.442695, %v302_v7  ;;  %v258_v56 = vsel %vm257_vm8, %v1410_v41, %v256_v62  ;;  %vm271_vm0 = vcmp.eq.f32.partialorder %v1419_v52, 0.0 }
  0x62   :  { %v518_v5 = vsel %vm514_vm4, %v517_v50, 0.0  ;;  %v268_v6 = vmul.f32 %v267_v63, %v1419_v52  ;;  %v261_v8 = vsel %vm259_vm11, %v260_v9, %v258_v56  ;;  %vm276_vm1 = vcmask 1041408  }
  0x63   :  { %519 = vadd.xlane.f32.xlu1 %v518_v5  ;;  %v600_v10 = vsel %vm1491_vm15, %v859_v32, %v596_v2  ;;  %864 = vpow2.f32 %v309_v3  ;;  %v274_v16 = vadd.f32 %v261_v8, %v1399_v30  ;;  %vm614_vm2 = vcmp.eq.f32.partialorder %v1476_v47, inf }
  0x64   :  { %v861_v13 = vpop.eup %860  ;;  %v270_v15 = vsel %vm269_vm12, %v1419_v52, %v268_v6  ;;  %v605_v17 = vsel %vm1483_vm14, %v604_v1, %v600_v10  ;;  %866 = vpow2.f32 %v311_v57  ;;  %v328_v49 = vsub.f32 %v306_v34, %v298_v26 }
  0x65   :  { %v863_v19 = vpop.eup %862  ;;  %v273_v20 = vsel %vm271_vm0, %v272_v53, %v270_v15  ;;  %v1514_v41 = vmul.f32 %v605_v17, %v1438_v14  ;;  %v608_v9 = vmul.f32 %v861_v13, %v1476_v47  ;;  %868 = vpow2.f32 %v313_v4  ;;  %v295_v14 = vld [vmem:[%s1638_s3] sm:$0x1] }
  0x66   :  { %v275_v18 = vadd.f32 %v273_v20, %v1401_v31  ;;  %v277_v21 = vsel %vm276_vm1, %v274_v16, 0.0  ;;  %v315_v52 = vadd.f32 0.001, %v863_v19  ;;  %v296_v31 = vld [vmem:[%s1638_s3 + $0x1] sm:$0x1]  ;;  %v325_v48 = vsub.f32 %v303_v12, %v295_v14 }
  0x67   :  { %v609_v22 = vmul.f32 %v861_v13, %v608_v9  ;;  %870 = vrsqrt.f32 %v1514_v41  ;;  %v327_v42 = vsub.f32 %v304_v28, %v296_v31  ;;  %vm616_vm3 = vcmp.eq.f32.partialorder %v1476_v47, 0.0 }
  0x68   :  { %v278_v30 = vsel %vm276_vm1, %v275_v18, 0.0  ;;  %872 = vlog2.f32 %v1369_v11  ;;  %v617_v51 = vand.u32 2147483648, %v1476_v47  ;;  %v326_v7 = vsub.f32 %v305_v43, %v297_v61 }
  0x69   :  { %v865_v23 = vpop.eup %864  ;;  %v279_v24 = vadd.f32 %v278_v30, %v277_v21  ;;  %v610_v25 = vmul.f32 0.5, %v609_v22  ;;  %874 = vlog2.f32 %v1424_v55  ;;  %v333_v54 = vmul.f32 %v327_v42, %v327_v42 }
  0x6a   :  { %v867_v27 = vpop.eup %866  ;;  %v316_v29 = vadd.f32 0.001, %v865_v23  ;;  %v329_v60 = vmul.f32 %v325_v48, %v325_v48  ;;  %v334_v50 = vmul.f32 %v328_v49, %v328_v49  ;;  %vm626_vm4 = vcmp.eq.f32.partialorder %v1514_v41, inf }
  0x6b   :  { %v869_v11 = vpop.eup %868  ;;  %v280_v32 = vsel %vm276_vm1, %v279_v24, 0.0  ;;  %v611_v33 = vsub.f32 1.5, %v610_v25  ;;  %v317_v35 = vadd.f32 0.001, %v867_v27  ;;  %vm633_vm5 = vcmask 24576  }
  0x6c   :  { %281 = vadd.xlane.f32.xlu0 %v280_v32  ;;  %v318_v36 = vadd.f32 0.001, %v869_v11  ;;  %v1533_v37 = vmul.f32 %v316_v29, %v315_v52  ;;  %vm628_vm6 = vcmp.eq.f32.partialorder %v1514_v41, 0.0  ;;  %v629_v3 = vand.u32 2147483648, %v1514_v41 }
  0x6d   :  { %v871_v38 = vpop.eup %870  ;;  %v612_v39 = vmul.f32 %v861_v13, %v611_v33  ;;  %v335_v57 = vmul.f32 %v333_v54, %v315_v52  ;;  %v331_v5 = vmul.f32 %v329_v60, %v316_v29  ;;  %v336_v56 = vmul.f32 %v334_v50, %v317_v35 }
  0x6e   :  { %v620_v55 = vmul.f32 %v871_v38, %v1514_v41  ;;  %v1540_v46 = vmul.f32 %v318_v36, %v317_v35  ;;  %v873_v44 = vpop.eup %872  ;;  %876 = vrcp.f32 %v1533_v37  ;;  %vm344_vm7 = vweird.f32 %v1533_v37 }
  0x6f   :  { %v613_v45 = vmul.f32 %v612_v39, %v1476_v47  ;;  %v875_v40 = vpop.eup %874  ;;  %v560_v62 = vmul.f32 0.6931472, %v873_v44  ;;  %v348_v13 = vand.u32 2147483647, %v1533_v37  ;;  %v350_v15 = vand.u32 2147483648, %v1533_v37 }
  0x70   :  { %v621_v53 = vmul.f32 %v871_v38, %v620_v55  ;;  %878 = vrcp.f32 %v1540_v46  ;;  %v562_v63 = vmul.f32 0.6931472, %v875_v40  ;;  %vm359_vm9 = vweird.f32 %v1540_v46 }
  0x71   :  { %v615_v58 = vsel %vm614_vm2, %v1476_v47, %v613_v45  ;;  %v330_v47 = vmul.f32 %v326_v7, %v326_v7  ;;  %v363_v9 = vand.u32 2147483647, %v1540_v46  ;;  %v365_v18 = vand.u32 2147483648, %v1540_v46 }
  0x72   :  { %v622_v59 = vmul.f32 0.5, %v621_v53  ;;  %v618_v0 = vsel %vm616_vm3, %v617_v51, %v615_v58  ;;  %v337_v23 = vadd.f32 %v335_v57, %v331_v5  ;;  %vm349_vm12 = vcmp.eq.f32.partialorder %v348_v13, 8.507059e+37  ;;  %v659_v13 = vld [vmem:[%s1648_s13 + $0x3] sm:$0x1] }
  0x73   :  { %v631_v10 = vadd.f32 %v618_v0, %v560_v62  ;;  %v332_v20 = vmul.f32 %v330_v47, %v318_v36  ;;  %v351_v25 = vor.u32 1.1754944e-38, %v350_v15  ;;  %vm364_vm14 = vcmp.eq.f32.partialorder %v363_v9, 8.507059e+37 }
  0x74   :  { %v623_v1 = vsub.f32 1.5, %v622_v59  ;;  %v877_v2 = vpop.eup %876  ;;  %vm395_vm3 = vcmask 516096  }
  0x75   :  { %v340_v6 = vmul.f32 %v877_v2, %v1533_v37  ;;  %vm345_vm8 = vweird.f32 %v877_v2  ;;  %v634_v31 = vsel %vm633_vm5, %v631_v10, 0.0  ;;  %v338_v12 = vadd.f32 %v336_v56, %v332_v20  ;;  %v658_v10 = vld [vmem:[%s1648_s13 + $0x2] sm:$0x1] }
  0x76   :  { %v624_v4 = vmul.f32 %v871_v38, %v623_v1  ;;  %v879_v8 = vpop.eup %878  ;;  %vm1567_vm11 = vmor %vm344_vm7, %vm345_vm8 }
  0x77   :  { %v341_v17 = vsub.f32 1.0, %v340_v6  ;;  %v355_v19 = vmul.f32 %v879_v8, %v1540_v46  ;;  %vm360_vm10 = vweird.f32 %v879_v8  ;;  %v656_v6 = vld [vmem:[%s1648_s13] sm:$0x1] }
  0x78   :  { %v625_v16 = vmul.f32 %v624_v4, %v1514_v41  ;;  %vm361_vm13 = vmor %vm359_vm9, %vm360_vm10  ;;  %v664_v15 = vmul.f32 1.442695, %v656_v6 }
  0x79   :  { %v342_v22 = vmul.f32 %v877_v2, %v341_v17  ;;  %v356_v30 = vsub.f32 1.0, %v355_v19  ;;  %v668_v17 = vmul.f32 1.442695, %v658_v10  ;;  %v670_v19 = vmul.f32 1.442695, %v659_v13 }
  0x7a   :  { %v627_v21 = vsel %vm626_vm4, %v1514_v41, %v625_v16  ;;  %v366_v41 = vor.u32 1.1754944e-38, %v365_v18 }
  0x7b   :  { %v630_v52 = vsel %vm628_vm6, %v629_v3, %v627_v21  ;;  %v343_v26 = vadd.f32 %v877_v2, %v342_v22  ;;  %v357_v27 = vmul.f32 %v879_v8, %v356_v30 }
  0x7c   :  { %v632_v14 = vadd.f32 %v630_v52, %v562_v63 }
  0x7d   :  { %v347_v29 = vsel %vm1567_vm11, %v877_v2, %v343_v26  ;;  %v358_v11 = vadd.f32 %v879_v8, %v357_v27  ;;  %v652_v27 = vld [vmem:[%s1647_s12] sm:$0x1] }
  0x7e   :  { %v635_v28 = vsel %vm633_vm5, %v632_v14, 0.0  ;;  %v352_v33 = vsel %vm349_vm12, %v351_v25, %v347_v29 }
  0x7f   :  { %v636_v32 = vadd.f32 %v635_v28, %v634_v31  ;;  %v353_v34 = vmul.f32 %v352_v33, %v337_v23  ;;  %v362_v35 = vsel %vm361_vm13, %v879_v8, %v358_v11  ;;  %v657_v8 = vld [vmem:[%s1648_s13 + $0x1] sm:$0x1]  ;;  %v655_v11 = vld [vmem:[%s1647_s12 + $0x3] sm:$0x1] }
  0x80   :  { %v367_v38 = vsel %vm364_vm14, %v366_v41, %v362_v35  ;;  %v666_v16 = vmul.f32 1.442695, %v657_v8  ;;  %v654_v41 = vld [vmem:[%s1647_s12 + $0x2] sm:$0x1]  ;;  %v661_v33 = vld [vmem:[%s1649_s14 + $0x1] sm:$0x1] }
  0x81   :  { %v637_v36 = vsel %vm633_vm5, %v636_v32, 0.0  ;;  %v368_v39 = vmul.f32 %v367_v38, %v338_v12  ;;  %880 = vrsqrt.f32 %v353_v34  ;;  %vm376_vm15 = vcmp.eq.f32.partialorder %v353_v34, inf  ;;  %v653_v12 = vld [vmem:[%s1647_s12 + $0x1] sm:$0x1]  ;;  %v660_v32 = vld [vmem:[%s1649_s14] sm:$0x1] }
  0x82   :  { %638 = vadd.xlane.f32.xlu1 %v637_v36  ;;  %v379_v54 = vand.u32 2147483648, %v353_v34  ;;  %vm378_vm0 = vcmp.eq.f32.partialorder %v353_v34, 0.0  ;;  %v663_v35 = vld [vmem:[%s1649_s14 + $0x3] sm:$0x1]  ;;  %v682_v36 = vsub.f32 %v660_v32, %v652_v27  ;;  %v684_v38 = vsub.f32 %v661_v33, %v653_v12 }
  0x83   :  { %882 = vrsqrt.f32 %v368_v39  ;;  %vm388_vm1 = vcmp.eq.f32.partialorder %v368_v39, inf  ;;  %vm390_vm2 = vcmp.eq.f32.partialorder %v368_v39, 0.0 }
  0x84   :  { %884 = vlog2.f32 %v1533_v37  ;;  %v391_v37 = vand.u32 2147483648, %v368_v39 }
  0x85   :  { %886 = vlog2.f32 %v1540_v46 }
  0x86   :  { %888 = vpow2.f32 %v664_v15 }
  0x87   :  { %v881_v42 = vpop.eup %880  ;;  %890 = vpow2.f32 %v666_v16 }
  0x88   :  { %v370_v55 = vmul.f32 %v881_v42, %v353_v34  ;;  %892 = vpow2.f32 %v668_v17 }
  0x89   :  { %v883_v61 = vpop.eup %882  ;;  %894 = vpow2.f32 %v670_v19 }
  0x8a   :  { %v371_v43 = vmul.f32 %v881_v42, %v370_v55  ;;  %v382_v48 = vmul.f32 %v883_v61, %v368_v39  ;;  %v885_v51 = vpop.eup %884 }
  0x8b   :  { %v887_v7 = vpop.eup %886  ;;  %v322_v59 = vmul.f32 0.6931472, %v885_v51 }
  0x8c   :  { %v372_v49 = vmul.f32 0.5, %v371_v43  ;;  %v383_v44 = vmul.f32 %v883_v61, %v382_v48  ;;  %v324_v62 = vmul.f32 0.6931472, %v887_v7  ;;  %v889_v20 = vpop.eup %888  ;;  %v686_v48 = vmul.f32 %v682_v36, %v682_v36 }
  0x8d   :  { %v891_v9 = vpop.eup %890  ;;  %v672_v18 = vadd.f32 0.001, %v889_v20 }
  0x8e   :  { %v373_v45 = vsub.f32 1.5, %v372_v49  ;;  %v384_v40 = vmul.f32 0.5, %v383_v44  ;;  %v893_v21 = vpop.eup %892  ;;  %v673_v22 = vadd.f32 0.001, %v891_v9  ;;  %v690_v49 = vmul.f32 %v684_v38, %v684_v38 }
  0x8f   :  { %v895_v30 = vpop.eup %894  ;;  %v674_v52 = vadd.f32 0.001, %v893_v21 }
  0x90   :  { %v374_v53 = vmul.f32 %v881_v42, %v373_v45  ;;  %v385_v58 = vsub.f32 1.5, %v384_v40  ;;  %v675_v23 = vadd.f32 0.001, %v895_v30  ;;  %v1592_v24 = vmul.f32 %v673_v22, %v672_v18 }
  0x92   :  { %v375_v60 = vmul.f32 %v374_v53, %v353_v34  ;;  %v386_v50 = vmul.f32 %v883_v61, %v385_v58  ;;  %v1594_v25 = vmul.f32 %v675_v23, %v674_v52  ;;  %896 = vrcp.f32 %v1592_v24 }
  0x93   :  { %v685_v61 = vsub.f32 %v663_v35, %v655_v11  ;;  %v707_v45 = vand.u32 2147483648, %v1592_v24  ;;  %vm701_vm4 = vweird.f32 %v1592_v24  ;;  %v688_v53 = vmul.f32 %v686_v48, %v673_v22 }
  0x94   :  { %v377_v63 = vsel %vm376_vm15, %v353_v34, %v375_v60  ;;  %v387_v0 = vmul.f32 %v386_v50, %v368_v39  ;;  %898 = vrcp.f32 %v1594_v25  ;;  %v662_v34 = vld [vmem:[%s1649_s14 + $0x2] sm:$0x1]  ;;  %v692_v58 = vmul.f32 %v690_v49, %v672_v18 }
  0x95   :  { %v380_v46 = vsel %vm378_vm0, %v379_v54, %v377_v63  ;;  %v683_v55 = vsub.f32 %v662_v34, %v654_v41  ;;  %v691_v51 = vmul.f32 %v685_v61, %v685_v61  ;;  %v705_v54 = vand.u32 2147483647, %v1592_v24 }
  0x96   :  { %v389_v1 = vsel %vm388_vm1, %v368_v39, %v387_v0  ;;  %v393_v2 = vadd.f32 %v380_v46, %v322_v59  ;;  %v708_v50 = vor.u32 1.1754944e-38, %v707_v45  ;;  %vm716_vm8 = vweird.f32 %v1594_v25 }
  0x97   :  { %v392_v3 = vsel %vm390_vm2, %v391_v37, %v389_v1  ;;  %v687_v40 = vmul.f32 %v683_v55, %v683_v55  ;;  %v693_v60 = vmul.f32 %v691_v51, %v674_v52  ;;  %vm706_vm7 = vcmp.eq.f32.partialorder %v705_v54, 8.507059e+37 }
  0x98   :  { %v394_v47 = vadd.f32 %v392_v3, %v324_v62  ;;  %v396_v57 = vsel %vm395_vm3, %v393_v2, 0.0  ;;  %v897_v31 = vpop.eup %896  ;;  %v694_v62 = vadd.f32 %v692_v58, %v688_v53  ;;  %v720_v2 = vand.u32 2147483647, %v1594_v25 }
  0x99   :  { %v697_v28 = vmul.f32 %v897_v31, %v1592_v24  ;;  %vm702_vm5 = vweird.f32 %v897_v31  ;;  %v689_v59 = vmul.f32 %v687_v40, %v675_v23  ;;  %v722_v3 = vand.u32 2147483648, %v1594_v25 }
  0x9a   :  { %v397_v4 = vsel %vm395_vm3, %v394_v47, 0.0  ;;  %v899_v29 = vpop.eup %898  ;;  %vm703_vm6 = vmor %vm701_vm4, %vm702_vm5  ;;  %vm721_vm11 = vcmp.eq.f32.partialorder %v720_v2, 8.507059e+37  ;;  %vm752_vm0 = vcmask 0  }
  0x9b   :  { %v398_v5 = vadd.f32 %v397_v4, %v396_v57  ;;  %v698_v39 = vsub.f32 1.0, %v697_v28  ;;  %v712_v43 = vmul.f32 %v899_v29, %v1594_v25  ;;  %vm717_vm9 = vweird.f32 %v899_v29 }
  0x9c   :  { %vm718_vm10 = vmor %vm716_vm8, %vm717_vm9  ;;  %v695_v57 = vadd.f32 %v693_v60, %v689_v59 }
  0x9d   :  { %v399_v56 = vsel %vm395_vm3, %v398_v5, 0.0  ;;  %v699_v44 = vmul.f32 %v897_v31, %v698_v39  ;;  %v713_v37 = vsub.f32 1.0, %v712_v43  ;;  %v723_v5 = vor.u32 1.1754944e-38, %v722_v3 }
  0x9e   :  { %400 = vadd.xlane.f32.xlu0 %v399_v56 }
  0x9f   :  { %v700_v7 = vadd.f32 %v897_v31, %v699_v44  ;;  %v714_v46 = vmul.f32 %v899_v29, %v713_v37 }
  0xa1   :  { %v704_v63 = vsel %vm703_vm6, %v897_v31, %v700_v7  ;;  %v715_v4 = vadd.f32 %v899_v29, %v714_v46 }
  0xa2   :  { %v709_v0 = vsel %vm706_vm7, %v708_v50, %v704_v63 }
  0xa3   :  { %v710_v1 = vmul.f32 %v709_v0, %v694_v62  ;;  %v719_v56 = vsel %vm718_vm10, %v899_v29, %v715_v4 }
  0xa4   :  { %v724_v6 = vsel %vm721_vm11, %v723_v5, %v719_v56 }
  0xa5   :  { %900 = vrsqrt.f32 %v710_v1  ;;  %v725_v10 = vmul.f32 %v724_v6, %v695_v57  ;;  %vm733_vm12 = vcmp.eq.f32.partialorder %v710_v1, inf  ;;  %v736_v35 = vand.u32 2147483648, %v710_v1 }
  0xa6   :  { %vm735_vm14 = vcmp.eq.f32.partialorder %v710_v1, 0.0 }
  0xa7   :  { %902 = vrsqrt.f32 %v725_v10  ;;  %vm745_vm13 = vcmp.eq.f32.partialorder %v725_v10, inf  ;;  %v748_v36 = vand.u32 2147483648, %v725_v10  ;;  %vm747_vm15 = vcmp.eq.f32.partialorder %v725_v10, 0.0 }
  0xa8   :  { %904 = vlog2.f32 %v1592_v24 }
  0xa9   :  { %906 = vlog2.f32 %v1594_v25 }
  0xab   :  { %v901_v16 = vpop.eup %900 }
  0xac   :  { %v727_v19 = vmul.f32 %v901_v16, %v710_v1 }
  0xad   :  { %v903_v17 = vpop.eup %902 }
  0xae   :  { %v739_v20 = vmul.f32 %v903_v17, %v725_v10  ;;  %v728_v18 = vmul.f32 %v901_v16, %v727_v19  ;;  %v905_v32 = vpop.eup %904 }
  0xaf   :  { %v907_v33 = vpop.eup %906  ;;  %v679_v61 = vmul.f32 0.6931472, %v905_v32 }
  0xb0   :  { %v740_v21 = vmul.f32 %v903_v17, %v739_v20  ;;  %v729_v22 = vmul.f32 0.5, %v728_v18  ;;  %v681_v25 = vmul.f32 0.6931472, %v907_v33 }
  0xb2   :  { %v741_v30 = vmul.f32 0.5, %v740_v21  ;;  %v730_v23 = vsub.f32 1.5, %v729_v22 }
  0xd6   :  { %v520_v9 = vpop.xlane.xlu1 %519 }
  0xd7   :  { %v521_v12 = vrot.slane %v520_v9, 4 }
  0xd9   :  { %v522_v11 = vadd.f32 %v521_v12, %v520_v9 }
  0xdb   :  { %v523_v24 = vrot.slane %v522_v11, 2 }
  0xdd   :  { %v524_v45 = vadd.f32 %v523_v24, %v522_v11 }
  0xdf   :  { %v282_v14 = vpop.xlane.xlu0 %281  ;;  %v525_v54 = vrot.slane %v524_v45, 1 }
  0xe0   :  { %v283_v26 = vrot.slane %v282_v14, 4 }
  0xe1   :  { %v526_v63 = vadd.f32 %v525_v54, %v524_v45 }
  0xe2   :  { %v284_v42 = vadd.f32 %v283_v26, %v282_v14  ;;  %v742_v14 = vsub.f32 1.5, %v741_v30  ;;  %v731_v26 = vmul.f32 %v901_v16, %v730_v23 }
  0xe4   :  { %v285_v47 = vrot.slane %v284_v42, 2  ;;  %v743_v27 = vmul.f32 %v903_v17, %v742_v14  ;;  %v732_v28 = vmul.f32 %v731_v26, %v710_v1 }
  0xe6   :  { %v286_v8 = vadd.f32 %v285_v47, %v284_v42  ;;  %v744_v29 = vmul.f32 %v743_v27, %v725_v10  ;;  %v734_v38 = vsel %vm733_vm12, %v710_v1, %v732_v28 }
  0xe7   :  { %v737_v43 = vsel %vm735_vm14, %v736_v35, %v734_v38 }
  0xe8   :  { %v287_v13 = vrot.slane %v286_v8, 1  ;;  %v746_v39 = vsel %vm745_vm13, %v725_v10, %v744_v29  ;;  %v750_v51 = vadd.f32 %v737_v43, %v679_v61 }
  0xe9   :  { %v749_v48 = vsel %vm747_vm15, %v748_v36, %v746_v39 }
  0xea   :  { %v288_v15 = vadd.f32 %v287_v13, %v286_v8  ;;  %v751_v53 = vadd.f32 %v749_v48, %v681_v25  ;;  %v753_v60 = vsel %vm752_vm0, %v750_v51, 0.0 }
  0xec   :  { %785 = vpush %v288_v15  ;;  %v754_v50 = vsel %vm752_vm0, %v751_v53, 0.0 }
  0xed   :  { %v755_v0 = vadd.f32 %v754_v50, %v753_v60 }
  0xf5   :  { %v639_v52 = vpop.xlane.xlu1 %638 }
  0xf6   :  { %v640_v31 = vrot.slane %v639_v52, 4 }
  0xf8   :  { %v641_v41 = vadd.f32 %v640_v31, %v639_v52 }
  0xfa   :  { %v642_v34 = vrot.slane %v641_v41, 2 }
  0xfc   :  { %v643_v49 = vadd.f32 %v642_v34, %v641_v41 }
  0xfe   :  { %v644_v7 = vrot.slane %v643_v49, 1 }
 0x100   :  { %v645_v62 = vadd.f32 %v644_v7, %v643_v49 }
 0x111   :  { %v401_v42 = vpop.xlane.xlu0 %400 }
 0x112   :  { %v402_v55 = vrot.slane %v401_v42, 4 }
 0x114   :  { %v403_v44 = vadd.f32 %v402_v55, %v401_v42 }
 0x116   :  { %v404_v40 = vrot.slane %v403_v44, 2 }
 0x118   :  { %v405_v58 = vadd.f32 %v404_v40, %v403_v44 }
 0x11a   :  { %v406_v59 = vrot.slane %v405_v58, 1 }
 0x11c   :  { %v407_v37 = vadd.f32 %v406_v59, %v405_v58 }
 0x11d   :  { %s786_s12 = spop %785 }
 0x11e   :  { %787 = vpush %v407_v37  ;;  %s290_s14 = smul.f32 0.001953125, %s786_s12 }
 0x11f   :  { %789 = vpush %v526_v63  ;;  %s293_s2 = smul.f32 0.005, %s786_s12 }
 0x120   :  { %791 = vpush %v645_v62  ;;  %292 = sst [smem:[#allocation16]] %s290_s14 }
 0x121   :  { %793 = vpush %v755_v0 }
 0x14f   :  { %s788_s3 = spop %787 }
 0x150   :  { %s409_s18 = smul.f32 0.0078125, %s788_s3  ;;  %s790_s29 = spop %789 }
 0x151   :  { %s412_s7 = smul.f32 0.01, %s788_s3  ;;  %s792_s1 = spop %791 }
 0x152   :  { %411 = sst [smem:[#allocation16 + $0x1]] %s409_s18  ;;  %s528_s16 = smul.f32 0.03125, %s790_s29 }
 0x153   :  { %s413_s19 = sadd.f32 %s412_s7, %s293_s2  ;;  %s531_s17 = smul.f32 0.02, %s790_s29 }
 0x154   :  { %530 = sst [smem:[#allocation16 + $0x2]] %s528_s16  ;;  %s647_s13 = smul.f32 0.125, %s792_s1 }
 0x155   :  { %s532_s20 = sadd.f32 %s531_s17, %s413_s19  ;;  %s650_s5 = smul.f32 0.08, %s792_s1 }
 0x156   :  { %649 = sst [smem:[#allocation16 + $0x3]] %s647_s13  ;;  %s794_s22 = spop %793 }
 0x157   :  { %s651_s0 = sadd.f32 %s650_s5, %s532_s20  ;;  %s758_s4 = smul.f32 0.5, %s794_s22 }
 0x158   :  { %s761_s6 = smul.f32 0.32, %s794_s22 }
 0x159   :  { %760 = sst [smem:[#allocation16 + $0x4]] %s758_s4 }
 0x15a   :  { %s762_s15 = sadd.f32 %s761_s6, %s651_s0 }
 0x15c   :  { %764 = sst [smem:[#allocation16 + $0x5]] %s762_s15 }
 0x15d   :  { %773 = dma.smem_to_hbm %s1136_s23, 16, %s771_s27, [#allocation4]  }
 0x15e   :  { %1122 = dma.done.wait [#allocation4], 16  }
 0x15f   :  { %1123 = vsyncadd [#allocation4], 4294967280 }
 0x160   :  { %778 = sfence }
 0x161   :  { %779 = vsyncpa [#allocation3], 1 }
 0x162   :  { %780 = vsyncpa [#allocation6], 1 }
 0x163   :  { %781 = vsyncpa [#allocation9], 1 }
 0x164   :  { %782 = vsyncpa [#allocation12], 1 }
 0x165   :  { %783 = vsyncpa [#allocation15], 1 }
 0x166   :  { %784 = vsyncpa [#allocation4], 1 }

</bundles_post_ra>
